<compile_context>
chip_gen: v7x
topology: tpu7x:2x2x1
jax: 0.10.0
libtpu: 0.0.40
codegen_flags: <defaults>
</compile_context>

<pallas_src>
import math

import jax
import jax.numpy as jnp
from jax import lax
from jax.experimental import pallas as pl
from jax.experimental.pallas import tpu as pltpu


def _build_fixed_table(c_in: int, d_model: int) -> jnp.ndarray:
    """Deterministic sinusoidal table, identical to FixedEmbedding.__init__."""
    position = jnp.arange(c_in, dtype=jnp.float32)[:, None]            # (c_in, 1)
    div_term = jnp.exp(
        jnp.arange(0, d_model, 2, dtype=jnp.float32)
        * -(math.log(10000.0) / d_model)
    )                                                                  # (ceil(d_model/2),)
    w = jnp.zeros((c_in, d_model), dtype=jnp.float32)
    w = w.at[:, 0::2].set(jnp.sin(position * div_term))
    w = w.at[:, 1::2].set(jnp.cos(position * div_term)[:, : d_model // 2])
    return w


def _embed_kernel(idx_ref, w_ref, o_ref):
    # idx_ref : (TM, pack) int32            -- pack indices per packed output row
    # w_ref   : (pack*c_in, pack*d_model)   -- block-diagonal wide table (VMEM
    #                                          resident, constant index_map)
    # o_ref   : (TM, pack*d_model) f32      -- lane-dense output tile
    idx = idx_ref[...]
    w = w_ref[...]
    tm, pack = idx.shape
    c_in = w.shape[0] // pack

    # One-hot over the wide table's row axis, built group by group (static,
    # pack <= 16 unrolled loop), then one MXU matmul gathers + packs the rows.
    cols = lax.broadcasted_iota(jnp.int32, (tm, pack * c_in), 1)
    onehot = (cols == idx[:, 0:1]).astype(jnp.float32)
    for g in range(1, pack):
        off = idx[:, g:g + 1] + g * c_in                 # (TM, 1), lane-broadcast
        onehot = onehot + (cols == off).astype(jnp.float32)

    o_ref[...] = jnp.dot(
        onehot, w, preferred_element_type=jnp.float32
    ).astype(o_ref.dtype)


def fixed_embedding(x: jnp.ndarray, w: jnp.ndarray, *, max_rows_per_step: int = 512) -> jnp.ndarray:
    """Pallas equivalent of FixedEmbedding.forward(x) = emb(x).detach()."""
    c_in, d_model = w.shape
    orig_shape = x.shape
    idx = jnp.clip(x.reshape(-1).astype(jnp.int32), 0, c_in - 1)
    n = idx.shape[0]

    # Packing factor so each output row fills 128 lanes (unmasked stores).
    if d_model % 128 == 0:
        pack = 1
    elif 128 % d_model == 0:
        pack = 128 // d_model
    else:
        pack = 1  # TODO(synk): d_model neither divides nor is a multiple of 128 -> masked stores remain

    lanes = pack * d_model

    # Tile sizing: TM packed rows (each = `pack` embedding rows) per grid step.
    packed_rows_needed = -(-n // pack)
    tm = min(max_rows_per_step, -(-packed_rows_needed // 8) * 8)   # multiple of 8
    n_packed = -(-packed_rows_needed // tm) * tm
    n_pad = n_packed * pack
    grid = (n_packed // tm,)

    idx_pad = jnp.pad(idx, (0, n_pad - n)).reshape(n_packed, pack)

    # Block-diagonal wide table: group g maps w into lanes [g*d_model, (g+1)*d_model).
    if pack == 1:
        w_wide = w
    else:
        w_wide = jnp.zeros((pack * c_in, lanes), w.dtype)
        for g in range(pack):
            w_wide = w_wide.at[
                g * c_in:(g + 1) * c_in, g * d_model:(g + 1) * d_model
            ].set(w)

    cost = pl.CostEstimate(
        flops=2 * n_packed * (pack * c_in) * lanes,
        transcendentals=0,
        bytes_accessed=(idx_pad.size * 4 + w_wide.size * 4 + n_packed * lanes * 4),
    )
    # Resident table + double-buffered idx/out tiles, with headroom; stays
    # within v7x's 64 MiB physical VMEM and above v5e's default scoped limit.
    vmem_need = w_wide.size * 4 + 2 * tm * pack * 4 + 2 * tm * lanes * 4
    vmem_limit = min(max(vmem_need + (4 << 20), 32 << 20), 64 << 20)

    out_packed = pl.pallas_call(
        _embed_kernel,
        out_shape=jax.ShapeDtypeStruct((n_packed, lanes), w.dtype),
        grid_spec=pltpu.PrefetchScalarGridSpec(
            num_scalar_prefetch=0,
            grid=grid,
            in_specs=[
                pl.BlockSpec((tm, pack), lambda i: (i, 0)),            # index tile
                pl.BlockSpec((pack * c_in, lanes), lambda i: (0, 0)),  # resident table
            ],
            out_specs=pl.BlockSpec((tm, lanes), lambda i: (i, 0)),
        ),
        compiler_params=pltpu.CompilerParams(
            dimension_semantics=("parallel",),   # independent tiles; 2 TCs on v7x
            vmem_limit_bytes=vmem_limit,
        ),
        cost_estimate=cost,
    )(idx_pad, w_wide)

    # Packed rows are byte-identical to the (n_pad, d_model) row-major layout.
    out = out_packed.reshape(n_pad, d_model)[:n]
    return out.reshape(*orig_shape, d_model)


if __name__ == "__main__":
    c_in, d_model = 24, 32     # e.g. hour-of-day embedding
    batch, seq = 2, 8

    key = jax.random.PRNGKey(0)
    x = jax.random.randint(key, (batch, seq), 0, c_in, dtype=jnp.int32)

    w = _build_fixed_table(c_in, d_model)

    out = fixed_embedding(x, w)
    out = jax.block_until_ready(out)

    # correctness check against the plain-JAX reference (table lookup)
    ref = jnp.take(w, x.reshape(-1), axis=0).reshape(batch, seq, d_model)
    assert out.shape == (batch, seq, d_model)
    assert out.dtype == jnp.float32
    assert jnp.allclose(out, ref, rtol=1e-5, atol=1e-6), "Pallas gather mismatch vs reference"

    print("KERNEL_OK")
</pallas_src>

<mosaic_0001>
module attributes {stable_mosaic.version = 11 : i64} {
  func.func @_embed_kernel(%arg0: i32, %arg1: memref<8x4xi32, #tpu.memory_space<vmem>>, %arg2: memref<96x128xf32, #tpu.memory_space<vmem>>, %arg3: memref<8x128xf32, #tpu.memory_space<vmem>>) attributes {dimension_semantics = [#tpu.dimension_semantics<parallel>], iteration_bounds = array<i64: 1>, scalar_prefetch = 0 : i64, scratch_operands = 0 : i64, tpu.core_type = #tpu.core_type<tc>, window_params = [{transform_indices = @transform_0, window_bounds = array<i64: 8, 4>}, {pipeline_mode = #tpu.pipeline_mode<synchronous>, transform_indices = @transform_1, window_bounds = array<i64: 96, 128>}, {transform_indices = @transform_2, window_bounds = array<i64: 8, 128>}]} {
    %c0 = arith.constant 0 : index
    %c0_0 = arith.constant 0 : index
    %0 = vector.load %arg1[%c0, %c0_0] : memref<8x4xi32, #tpu.memory_space<vmem>>, vector<8x4xi32>
    %c0_1 = arith.constant 0 : index
    %c0_2 = arith.constant 0 : index
    %1 = vector.load %arg2[%c0_1, %c0_2] : memref<96x128xf32, #tpu.memory_space<vmem>>, vector<96x128xf32>
    %2 = tpu.iota {dimensions = array<i32: 1>} : vector<8x96xi32>
    %3 = vector.extract_strided_slice %0 {offsets = [0, 0], sizes = [8, 1], strides = [1, 1]} : vector<8x4xi32> to vector<8x1xi32>
    %4 = vector.broadcast %3 : vector<8x1xi32> to vector<8x96xi32>
    %5 = arith.cmpi eq, %2, %4 : vector<8x96xi32>
    %6 = arith.extui %5 : vector<8x96xi1> to vector<8x96xi32>
    %7 = arith.sitofp %6 : vector<8x96xi32> to vector<8x96xf32>
    %8 = vector.extract_strided_slice %0 {offsets = [0, 1], sizes = [8, 1], strides = [1, 1]} : vector<8x4xi32> to vector<8x1xi32>
    %c24_i32 = arith.constant 24 : i32
    %9 = vector.broadcast %c24_i32 : i32 to vector<8x1xi32>
    %10 = arith.addi %8, %9 : vector<8x1xi32>
    %11 = vector.broadcast %10 : vector<8x1xi32> to vector<8x96xi32>
    %12 = arith.cmpi eq, %2, %11 : vector<8x96xi32>
    %13 = arith.extui %12 : vector<8x96xi1> to vector<8x96xi32>
    %14 = arith.sitofp %13 : vector<8x96xi32> to vector<8x96xf32>
    %15 = arith.addf %7, %14 : vector<8x96xf32>
    %16 = vector.extract_strided_slice %0 {offsets = [0, 2], sizes = [8, 1], strides = [1, 1]} : vector<8x4xi32> to vector<8x1xi32>
    %c48_i32 = arith.constant 48 : i32
    %17 = vector.broadcast %c48_i32 : i32 to vector<8x1xi32>
    %18 = arith.addi %16, %17 : vector<8x1xi32>
    %19 = vector.broadcast %18 : vector<8x1xi32> to vector<8x96xi32>
    %20 = arith.cmpi eq, %2, %19 : vector<8x96xi32>
    %21 = arith.extui %20 : vector<8x96xi1> to vector<8x96xi32>
    %22 = arith.sitofp %21 : vector<8x96xi32> to vector<8x96xf32>
    %23 = arith.addf %15, %22 : vector<8x96xf32>
    %24 = vector.extract_strided_slice %0 {offsets = [0, 3], sizes = [8, 1], strides = [1, 1]} : vector<8x4xi32> to vector<8x1xi32>
    %c72_i32 = arith.constant 72 : i32
    %25 = vector.broadcast %c72_i32 : i32 to vector<8x1xi32>
    %26 = arith.addi %24, %25 : vector<8x1xi32>
    %27 = vector.broadcast %26 : vector<8x1xi32> to vector<8x96xi32>
    %28 = arith.cmpi eq, %2, %27 : vector<8x96xi32>
    %29 = arith.extui %28 : vector<8x96xi1> to vector<8x96xi32>
    %30 = arith.sitofp %29 : vector<8x96xi32> to vector<8x96xf32>
    %31 = arith.addf %23, %30 : vector<8x96xf32>
    %cst = arith.constant dense<0.000000e+00> : vector<8x128xf32>
    %32 = tpu.matmul %31, %1, %cst {dimension_numbers = #tpu.dot_dimension_numbers<[1], [0], [0], [1], [0, 0, 1, 1], [], []>} : vector<8x96xf32>, vector<96x128xf32>, vector<8x128xf32> -> vector<8x128xf32>
    %c0_3 = arith.constant 0 : index
    %c0_4 = arith.constant 0 : index
    %33 = vector.load %arg3[%c0_3, %c0_4] : memref<8x128xf32, #tpu.memory_space<vmem>>, vector<8x128xf32>
    tpu.vector_store %arg3[%c0_3, %c0_4], %32 {strides = array<i32>} : memref<8x128xf32, #tpu.memory_space<vmem>>, vector<8x128xf32>,
    return
  }
  func.func @transform_0(%arg0: i32) -> (i32, i32) {
    %c0_i32 = arith.constant 0 : i32
    %c0_i32_0 = arith.constant 0 : i32
    return %arg0, %c0_i32 : i32, i32
  }
  func.func @transform_1(%arg0: i32) -> (i32, i32) {
    %c0_i32 = arith.constant 0 : i32
    %c0_i32_0 = arith.constant 0 : i32
    %c0_i32_1 = arith.constant 0 : i32
    return %c0_i32, %c0_i32_0 : i32, i32
  }
  func.func @transform_2(%arg0: i32) -> (i32, i32) {
    %c0_i32 = arith.constant 0 : i32
    %c0_i32_0 = arith.constant 0 : i32
    return %arg0, %c0_i32 : i32, i32
  }
}

</mosaic_0001>

<bundles_post_ra>
// kernel: tpu_custom_call.1
= control target key start
LH: loop header
LB: loop body
LE: loop exit
PB: predicated region body
PF: predicated region fallthrough
CT: control target
= control target key end

     0   :  { %7 = vsyncpa [#allocation3], 0  ;;  %s341_s0 = inlined_call_operand.vmem [shape: s32[8,4], index: 0, kind: input, shape index: {}]   ;;  %s342_s1 = inlined_call_operand.hbm [shape: f32[96,128], index: 1, kind: input, shape index: {}]   ;;  %s343_s2 = inlined_call_operand.hbm [shape: f32[8,128], index: 2, kind: output, shape index: {}]  }
   0x1   :  { %8 = vsyncpa [#allocation4], 0  ;;  %s288_s9 = smov [#allocation2]   ;;  %s240_s13 = scalar_lea.hbm %s342_s1, 1536 }
   0x2   :  { %s16_s10 = sshll.u32 %s288_s9, 4  ;;  %p241_p0 = scmp.ne.s32.totalorder %s342_s1, %s240_s13  ;;  %s17_s10 = int_to_ptr.vmem [resolvable:$true] %s16_s10 }
   0x3   :  { %p244_p1 = scmp.lt.u32.totalorder %s240_s13, %s342_s1 }
   0x5   :  { %p246_p2 = pnand %p244_p1, %p241_p0 }
   0x7   :  { %249 = shalt.err (!%p246_p2)
}
   0x8   :  { %s250_s18 = scalar_lea.vmem %s17_s10, 1536  ;;  %p255_p4 = scmp.lt.s32.totalorder %s17_s10, %s17_s10 }
   0x9   :  { %p251_p3 = scmp.ne.s32.totalorder %s17_s10, %s250_s18  ;;  %p256_p5 = scmp.lt.s32.totalorder %s250_s18, %s250_s18 }
   0xb   :  { %p257_p6 = por %p256_p5, %p255_p4 }
   0xd   :  { %p258_p7 = pnand %p257_p6, %p251_p3 }
   0xf   :  { %261 = shalt.err (!%p258_p7)
}
  0x10   :  { %s289_s19 = smov 128   ;;  %s290_s20 = smov 8  }
  0x11   :  { %22 = dma.hbm_to_vmem [thread:$0]  %s342_s1, 1536, %s17_s10, [#allocation3], %s289_s19, %s289_s19, %s290_s20  }
  0x12   :  { %284 = dma.done.wait [#allocation3], 1536  }
  0x13   :  { %285 = vsyncadd [#allocation3], 4294965760  ;;  %v291_v0 = vmov 0   ;;  %v292_v1 = vmov 2   ;;  %v293_v2 = vmov 0.0|0.0   ;;  %v26_v3 = vld [vmem:[%s341_s0] sm:$0xff]  ;;  %v39_v28 = vlaneseq }
  0x14   :  { %235 = vset.pattern.permute.xlu0 %v291_v0  ;;  %237 = vset.pattern.permute.xlu1 %v292_v1  ;;  %v27_v4 = vld [vmem:[#allocation2] sm:$0xff]  ;;  %v28_v5 = vld [vmem:[#allocation2 + $0x8] sm:$0xff]  ;;  %v55_v6 = vadd.s32 48, %v26_v3  ;;  %v29_v8 = vld [vmem:[#allocation2 + $0x10] sm:$0xff]  ;;  %v47_v10 = vadd.s32 24, %v26_v3  ;;  %v63_v12 = vadd.s32 72, %v26_v3 }
  0x15   :  { %206 = vmatprep.subr.bf16.mxu0 %v293_v2  ;;  %42 = vperm.xlu0 %235, %v26_v3   ;;  %v207_v7 = vpack.c.bf16 %v28_v5, %v27_v4  ;;  %v30_v9 = vld [vmem:[#allocation2 + $0x18] sm:$0xff]  ;;  %v31_v13 = vld [vmem:[#allocation2 + $0x20] sm:$0xff]  ;;  %v32_v14 = vld [vmem:[#allocation2 + $0x28] sm:$0xff]  ;;  %v294_v15 = vmov 1   ;;  %v295_v16 = vmov 3   ;;  %vm296_vm0 = vmmov 0  }
  0x16   :  { %57 = vperm.xlu1 %237, %v55_v6   ;;  %v210_v11 = vpack.c.bf16 %v30_v9, %v29_v8  ;;  %v213_v17 = vpack.c.bf16 %v32_v14, %v31_v13  ;;  %v33_v18 = vld [vmem:[#allocation2 + $0x30] sm:$0xff]  ;;  %v34_v19 = vld [vmem:[#allocation2 + $0x38] sm:$0xff]  ;;  %v35_v21 = vld [vmem:[#allocation2 + $0x40] sm:$0xff]  ;;  %v297_v23 = vmov 0.0   ;;  %v40_v29 = vand.u32 127, %v39_v28  ;;  %s298_s0 = smov [#allocation5]  }
  0x17   :  { %208 = vmatpush3.bf16.msra.mxu0 %v207_v7  ;;  %v216_v20 = vpack.c.bf16 %v34_v19, %v33_v18  ;;  %v36_v22 = vld [vmem:[#allocation2 + $0x48] sm:$0xff]  ;;  %203 = vmatprep.mubr.msk.f32.mxu0 %vm296_vm0, %v297_v23  ;;  %v37_v25 = vld [vmem:[#allocation2 + $0x50] sm:$0xff]  ;;  %v38_v26 = vld [vmem:[#allocation2 + $0x58] sm:$0xff]  ;;  %vm71_vm5 = vcmask 785408   ;;  %s152_s1 = sshll.u32 %s298_s0, 4  ;;  %s153_s1 = int_to_ptr.vmem [resolvable:$true] %s152_s1 }
  0x18   :  { %209 = vmatprep.subr.bf16.mxu0 %v293_v2  ;;  %v219_v24 = vpack.c.bf16 %v36_v22, %v35_v21  ;;  %v222_v27 = vpack.c.bf16 %v38_v26, %v37_v25  ;;  %s262_s25 = scalar_lea.vmem %s153_s1, 128  ;;  %p267_p9 = scmp.lt.s32.totalorder %s153_s1, %s153_s1 }
  0x19   :  { %236 = vset.pattern.permute.xlu0 %v294_v15  ;;  %p263_p8 = scmp.ne.s32.totalorder %s153_s1, %s262_s25  ;;  %p268_p10 = scmp.lt.s32.totalorder %s262_s25, %s262_s25 }
  0x1a   :  { %49 = vperm.xlu0 %236, %v47_v10   ;;  %238 = vset.pattern.permute.xlu1 %v295_v16 }
  0x1b   :  { %211 = vmatpush3.bf16.msra.mxu0 %v210_v11  ;;  %65 = vperm.xlu1 %238, %v63_v12   ;;  %p269_p11 = por %p268_p10, %p267_p9 }
  0x1c   :  { %212 = vmatprep.subr.bf16.mxu0 %v293_v2 }
  0x1d   :  { %p270_p12 = pnand %p269_p11, %p263_p8 }
  0x1e   :  { %239 = vset.pattern.permute.xlu0 %v295_v16 }
  0x1f   :  { %214 = vmatpush3.bf16.msra.mxu0 %v213_v17 }
  0x20   :  { %215 = vmatprep.subr.bf16.mxu0 %v293_v2 }
  0x23   :  { %217 = vmatpush3.bf16.msra.mxu0 %v216_v20 }
  0x24   :  { %218 = vmatprep.subr.bf16.mxu0 %v293_v2 }
  0x27   :  { %220 = vmatpush3.bf16.msra.mxu0 %v219_v24 }
  0x28   :  { %221 = vmatprep.subr.bf16.mxu0 %v293_v2 }
  0x2b   :  { %223 = vmatpush3.bf16.msra.mxu0 %v222_v27 }
  0x94   :  { %v43_v30 = vpop.permute.xlu0 %42 }
  0x95   :  { %v58_v31 = vpop.permute.xlu1 %57  ;;  %vm44_vm1 = vcmp.eq.s32.totalorder %v40_v29, %v43_v30 }
  0x96   :  { %vm59_vm2 = vcmp.eq.s32.totalorder %v40_v29, %v58_v31  ;;  %v161_v33 = vsel %vm44_vm1, 1.0, %v297_v23 }
  0x97   :  { %v163_v37 = vsel %vm59_vm2, 1.0, %v297_v23 }
  0x99   :  { %v50_v32 = vpop.permute.xlu0 %49 }
  0x9a   :  { %vm51_vm3 = vcmp.eq.s32.totalorder %v40_v29, %v50_v32  ;;  %v66_v35 = vpop.permute.xlu1 %65 }
  0x9b   :  { %v162_v34 = vsel %vm51_vm3, 1.0, %v297_v23  ;;  %vm67_vm4 = vcmp.eq.s32.totalorder %v40_v29, %v66_v35 }
  0x9c   :  { %v54_v36 = vadd.f32 %v162_v34, %v161_v33  ;;  %v164_v38 = vsel %vm67_vm4, 1.0, %v297_v23 }
  0x9e   :  { %v62_v39 = vadd.f32 %v163_v37, %v54_v36 }
  0xa0   :  { %v70_v40 = vadd.f32 %v164_v38, %v62_v39 }
  0xa2   :  { %204 = vmatmul.mubr.msk.f32.vlgmr.msra.gmra.mrb[0].mxu0 %vm71_vm5, %v70_v40 }
 0x175   :  { %v141_v41 = vpop.f32.mrb[0].mxu0 }
 0x176   :  { %145 = vst [vmem:[#allocation5] sm:$0xff] %v141_v41  ;;  %v205_v42 = vpop.f32.mrb[1].mxu0 }
 0x177   :  { %273 = shalt.err (!%p270_p12)
}
 0x178   :  { %s274_s28 = scalar_lea.hbm %s343_s2, 128 }
 0x179   :  { %p275_p13 = scmp.ne.s32.totalorder %s343_s2, %s274_s28  ;;  %p278_p0 = scmp.lt.u32.totalorder %s274_s28, %s343_s2 }
 0x17b   :  { %p280_p1 = pnand %p278_p0, %p275_p13 }
 0x17d   :  { %283 = shalt.err (!%p280_p1)
}
 0x17e   :  { %155 = dma.vmem_to_hbm [thread:$0]  %s153_s1, 128, %s343_s2, [#allocation4]  }
 0x17f   :  { %286 = dma.done.wait [#allocation4], 128  }
 0x180   :  { %287 = vsyncadd [#allocation4], 4294967168 }
 0x181   :  { %159 = vsyncpa [#allocation3], 1 }
 0x182   :  { %160 = vsyncpa [#allocation4], 1 }

</bundles_post_ra>
